<compile_context>
chip_gen: v6e
topology: v6e:2x2x1
jax: 0.10.0
libtpu: 0.0.40
codegen_flags: <defaults>
</compile_context>

<pallas_src>
import jax
import jax.numpy as jnp
from jax.experimental import pallas as pl
from jax.experimental.pallas import tpu as pltpu

INPUT_DIM = 3      # "3dim" problem
HIDDEN_DIM = 32    # config['model']['hidden_dim']
NUM_LAYERS = 2     # config['model']['num_layers'] -> Linear(D,H),Tanh,Linear(H,H),Softplus,Linear(H,D)


def _softplus(x):
    # matches torch.nn.Softplus(beta=1, threshold=20)
    return jnp.where(x > 20.0, x, jnp.log1p(jnp.exp(jnp.minimum(x, 20.0))))


# ---------------------------------------------------------------- kernel

def cs_neural_ode_kernel(u_ref, y0_ref, w1_ref, b1_ref, w2_ref, b2_ref, w3_ref, b3_ref,
                         out_ref):
    """Euler-integrates dy/dt = f(y) + g(y)*u(t) entirely in VMEM.

    u_ref  : VMEM (T-1, D)   precomputed u(t_i) * dt
    y0_ref : VMEM (B, D)     initial state
    w1/b1  : VMEM (D, 2H), (1, 2H)     fused first layer  [f | g]
    w2/b2  : VMEM (2H, 2H), (1, 2H)    block-diagonal middle layer
    w3/b3  : VMEM (2H, 2D), (1, 2D)    block-diagonal last layer, f-block pre-scaled by dt
    out_ref: VMEM (B, D)     final state y(t[-1])
    """
    B, D = y0_ref.shape
    n_steps = u_ref.shape[0]

    # Hoist parameter loads + bias broadcasts out of the loop (kept resident in vregs).
    w1 = w1_ref[...]
    w2 = w2_ref[...]
    w3 = w3_ref[...]
    b1 = jnp.broadcast_to(b1_ref[...], (B, w1.shape[1]))
    b2 = jnp.broadcast_to(b2_ref[...], (B, w2.shape[1]))
    b3 = jnp.broadcast_to(b3_ref[...], (B, w3.shape[1]))
    u_dt = u_ref[...]                                     # (n_steps, D), already * dt

    y = y0_ref[...].astype(jnp.float32)

    # Fully unrolled Euler loop: static slices, full LLO scheduler visibility.
    for i in range(n_steps):
        h = jnp.tanh(jnp.dot(y, w1, preferred_element_type=jnp.float32) + b1)
        h = _softplus(jnp.dot(h, w2, preferred_element_type=jnp.float32) + b2)
        z = jnp.dot(h, w3, preferred_element_type=jnp.float32) + b3   # (B, 2D) = [f*dt | g]
        f_dt = z[:, :D]
        g = z[:, D:]
        y = y + f_dt + g * u_dt[i:i + 1, :]               # u_dt row broadcasts over batch

    out_ref[...] = y.astype(out_ref.dtype)


# ---------------------------------------------------------------- parameters

def _init_linear(key, fan_in, fan_out):
    # PyTorch nn.Linear default: U(-1/sqrt(fan_in), 1/sqrt(fan_in))
    k = 1.0 / jnp.sqrt(jnp.float32(fan_in))
    kw, kb = jax.random.split(key)
    w = jax.random.uniform(kw, (fan_in, fan_out), jnp.float32, -k, k)
    b = jax.random.uniform(kb, (1, fan_out), jnp.float32, -k, k)
    return w, b


def init_odefunc_params(key, d=INPUT_DIM, h=HIDDEN_DIM):
    k1, k2, k3 = jax.random.split(key, 3)
    w1, b1 = _init_linear(k1, d, h)
    w2, b2 = _init_linear(k2, h, h)
    w3, b3 = _init_linear(k3, h, d)
    return (w1, b1, w2, b2, w3, b3)


def _fuse_params(params_f, params_g, dt):
    """Fuse f/g MLPs into one block-diagonal MLP; fold dt into f's last layer."""
    wf1, bf1, wf2, bf2, wf3, bf3 = params_f
    wg1, bg1, wg2, bg2, wg3, bg3 = params_g
    d, h = wf1.shape

    w1 = jnp.concatenate([wf1, wg1], axis=1)                        # (D, 2H)
    b1 = jnp.concatenate([bf1, bg1], axis=1)                        # (1, 2H)

    w2 = jnp.zeros((2 * h, 2 * h), jnp.float32)
    w2 = w2.at[:h, :h].set(wf2).at[h:, h:].set(wg2)                 # (2H, 2H) block-diag
    b2 = jnp.concatenate([bf2, bg2], axis=1)                        # (1, 2H)

    w3 = jnp.zeros((2 * h, 2 * d), jnp.float32)
    w3 = w3.at[:h, :d].set(wf3 * dt).at[h:, d:].set(wg3)            # (2H, 2D), f-block * dt
    b3 = jnp.concatenate([bf3 * dt, bg3], axis=1)                   # (1, 2D)

    return w1, b1, w2, b2, w3, b3


# TODO(synk): `my_u` is not defined in the source snippet; using a deterministic
# sin/cos control of dimension u_dim = input_dim.
def u_fn(t):
    return jnp.stack([jnp.sin(t), jnp.cos(t), jnp.sin(2.0 * t)])


# ---------------------------------------------------------------- wrapper

def cs_neural_ode_forward(y0, t, params_f, params_g):
    """y0: (B, 1, D), t: (T,)  ->  (B, 1, D) final state (== out[-1] of Euler stack)."""
    B, one, D = y0.shape
    assert one == 1 and D == INPUT_DIM
    y0_2d = y0.reshape(B, D).astype(jnp.float32)

    dt = (t[1] - t[0]).astype(jnp.float32)                  # uniform-grid assumption (as in ref)
    u_dt = (jax.vmap(u_fn)(t[:-1]) * dt).astype(jnp.float32)  # (T-1, D), pre-scaled by dt

    fused = _fuse_params(params_f, params_g, dt)            # 6 arrays

    out_2d = pl.pallas_call(
        cs_neural_ode_kernel,
        out_shape=jax.ShapeDtypeStruct((B, D), jnp.float32),
        in_specs=[pl.BlockSpec(memory_space=pltpu.MemorySpace.VMEM)] * 8,  # u_dt, y0, 6 params
        out_specs=pl.BlockSpec(memory_space=pltpu.MemorySpace.VMEM),
    )(u_dt, y0_2d, *fused)

    return out_2d.reshape(B, 1, D)


# ---------------------------------------------------------------- reference (pure JAX, unfused)

def _mlp_ref(y, p):
    w1, b1, w2, b2, w3, b3 = p
    h = jnp.tanh(y @ w1 + b1)
    h = _softplus(h @ w2 + b2)
    return h @ w3 + b3


def cs_neural_ode_ref(y0, t, params_f, params_g):
    B, _, D = y0.shape
    y = y0.reshape(B, D).astype(jnp.float32)
    dt = t[1] - t[0]
    for i in range(t.shape[0] - 1):
        u_t = u_fn(t[i])[None, :]
        y = y + (_mlp_ref(y, params_f) + _mlp_ref(y, params_g) * u_t) * dt
    return y.reshape(B, 1, D)


# ---------------------------------------------------------------- main

if __name__ == "__main__":
    key = jax.random.PRNGKey(0)
    k_y0, k_f, k_g = jax.random.split(key, 3)

    B, T = 2, 8
    y0 = jax.random.normal(k_y0, (B, 1, INPUT_DIM), jnp.float32)
    t = jnp.linspace(0.0, 1.0, T, dtype=jnp.float32)

    params_f = init_odefunc_params(k_f)
    params_g = init_odefunc_params(k_g)

    out = cs_neural_ode_forward(y0, t, params_f, params_g)
    out = jax.block_until_ready(out)

    ref = cs_neural_ode_ref(y0, t, params_f, params_g)
    assert out.shape == (B, 1, INPUT_DIM)
    assert jnp.allclose(out, ref, atol=1e-3, rtol=1e-3), (out, ref)

    print("KERNEL_OK")
</pallas_src>

<mosaic_0001>
module attributes {stable_mosaic.version = 11 : i64} {
  func.func @cs_neural_ode_kernel(%arg0: memref<7x3xf32, #tpu.memory_space<vmem>>, %arg1: memref<2x3xf32, #tpu.memory_space<vmem>>, %arg2: memref<3x64xf32, #tpu.memory_space<vmem>>, %arg3: memref<1x64xf32, #tpu.memory_space<vmem>>, %arg4: memref<64x64xf32, #tpu.memory_space<vmem>>, %arg5: memref<1x64xf32, #tpu.memory_space<vmem>>, %arg6: memref<64x6xf32, #tpu.memory_space<vmem>>, %arg7: memref<1x6xf32, #tpu.memory_space<vmem>>, %arg8: memref<2x3xf32, #tpu.memory_space<vmem>>) attributes {dimension_semantics = [], scalar_prefetch = 0 : i64, scratch_operands = 0 : i64, tpu.core_type = #tpu.core_type<tc>} {
    %c0 = arith.constant 0 : index
    %c0_0 = arith.constant 0 : index
    %0 = vector.load %arg2[%c0, %c0_0] : memref<3x64xf32, #tpu.memory_space<vmem>>, vector<3x64xf32>
    %c0_1 = arith.constant 0 : index
    %c0_2 = arith.constant 0 : index
    %1 = vector.load %arg4[%c0_1, %c0_2] : memref<64x64xf32, #tpu.memory_space<vmem>>, vector<64x64xf32>
    %c0_3 = arith.constant 0 : index
    %c0_4 = arith.constant 0 : index
    %2 = vector.load %arg6[%c0_3, %c0_4] : memref<64x6xf32, #tpu.memory_space<vmem>>, vector<64x6xf32>
    %c0_5 = arith.constant 0 : index
    %c0_6 = arith.constant 0 : index
    %3 = vector.load %arg3[%c0_5, %c0_6] : memref<1x64xf32, #tpu.memory_space<vmem>>, vector<1x64xf32>
    %4 = vector.shape_cast %3 : vector<1x64xf32> to vector<1x64xf32>
    %5 = vector.broadcast %4 : vector<1x64xf32> to vector<2x64xf32>
    %c0_7 = arith.constant 0 : index
    %c0_8 = arith.constant 0 : index
    %6 = vector.load %arg5[%c0_7, %c0_8] : memref<1x64xf32, #tpu.memory_space<vmem>>, vector<1x64xf32>
    %7 = vector.shape_cast %6 : vector<1x64xf32> to vector<1x64xf32>
    %8 = vector.broadcast %7 : vector<1x64xf32> to vector<2x64xf32>
    %c0_9 = arith.constant 0 : index
    %c0_10 = arith.constant 0 : index
    %9 = vector.load %arg7[%c0_9, %c0_10] : memref<1x6xf32, #tpu.memory_space<vmem>>, vector<1x6xf32>
    %10 = vector.shape_cast %9 : vector<1x6xf32> to vector<1x6xf32>
    %11 = vector.broadcast %10 : vector<1x6xf32> to vector<2x6xf32>
    %c0_11 = arith.constant 0 : index
    %c0_12 = arith.constant 0 : index
    %12 = vector.load %arg0[%c0_11, %c0_12] : memref<7x3xf32, #tpu.memory_space<vmem>>, vector<7x3xf32>
    %c0_13 = arith.constant 0 : index
    %c0_14 = arith.constant 0 : index
    %13 = vector.load %arg1[%c0_13, %c0_14] : memref<2x3xf32, #tpu.memory_space<vmem>>, vector<2x3xf32>
    %cst = arith.constant dense<0.000000e+00> : vector<2x64xf32>
    %14 = tpu.matmul %13, %0, %cst {dimension_numbers = #tpu.dot_dimension_numbers<[1], [0], [0], [1], [0, 0, 1, 1], [], []>} : vector<2x3xf32>, vector<3x64xf32>, vector<2x64xf32> -> vector<2x64xf32>
    %15 = arith.addf %14, %5 : vector<2x64xf32>
    %16 = math.tanh %15 : vector<2x64xf32>
    %cst_15 = arith.constant dense<0.000000e+00> : vector<2x64xf32>
    %17 = tpu.matmul %16, %1, %cst_15 {dimension_numbers = #tpu.dot_dimension_numbers<[1], [0], [0], [1], [0, 0, 1, 1], [], []>} : vector<2x64xf32>, vector<64x64xf32>, vector<2x64xf32> -> vector<2x64xf32>
    %18 = arith.addf %17, %8 : vector<2x64xf32>
    %cst_16 = arith.constant 2.000000e+01 : f32
    %19 = vector.broadcast %cst_16 : f32 to vector<2x64xf32>
    %20 = arith.cmpf ogt, %18, %19 : vector<2x64xf32>
    %cst_17 = arith.constant 2.000000e+01 : f32
    %21 = vector.broadcast %cst_17 : f32 to vector<2x64xf32>
    %22 = arith.minimumf %18, %21 : vector<2x64xf32>
    %23 = math.exp %22 : vector<2x64xf32>
    %24 = math.log1p %23 : vector<2x64xf32>
    %25 = arith.select %20, %18, %24 : vector<2x64xi1>, vector<2x64xf32>
    %cst_18 = arith.constant dense<0.000000e+00> : vector<2x6xf32>
    %26 = tpu.matmul %25, %2, %cst_18 {dimension_numbers = #tpu.dot_dimension_numbers<[1], [0], [0], [1], [0, 0, 1, 1], [], []>} : vector<2x64xf32>, vector<64x6xf32>, vector<2x6xf32> -> vector<2x6xf32>
    %27 = arith.addf %26, %11 : vector<2x6xf32>
    %28 = vector.extract_strided_slice %27 {offsets = [0, 0], sizes = [2, 3], strides = [1, 1]} : vector<2x6xf32> to vector<2x3xf32>
    %29 = vector.extract_strided_slice %27 {offsets = [0, 3], sizes = [2, 3], strides = [1, 1]} : vector<2x6xf32> to vector<2x3xf32>
    %30 = arith.addf %13, %28 : vector<2x3xf32>
    %31 = vector.extract_strided_slice %12 {offsets = [0, 0], sizes = [1, 3], strides = [1, 1]} : vector<7x3xf32> to vector<1x3xf32>
    %32 = vector.broadcast %31 : vector<1x3xf32> to vector<2x3xf32>
    %33 = arith.mulf %29, %32 : vector<2x3xf32>
    %34 = arith.addf %30, %33 : vector<2x3xf32>
    %cst_19 = arith.constant dense<0.000000e+00> : vector<2x64xf32>
    %35 = tpu.matmul %34, %0, %cst_19 {dimension_numbers = #tpu.dot_dimension_numbers<[1], [0], [0], [1], [0, 0, 1, 1], [], []>} : vector<2x3xf32>, vector<3x64xf32>, vector<2x64xf32> -> vector<2x64xf32>
    %36 = arith.addf %35, %5 : vector<2x64xf32>
    %37 = math.tanh %36 : vector<2x64xf32>
    %cst_20 = arith.constant dense<0.000000e+00> : vector<2x64xf32>
    %38 = tpu.matmul %37, %1, %cst_20 {dimension_numbers = #tpu.dot_dimension_numbers<[1], [0], [0], [1], [0, 0, 1, 1], [], []>} : vector<2x64xf32>, vector<64x64xf32>, vector<2x64xf32> -> vector<2x64xf32>
    %39 = arith.addf %38, %8 : vector<2x64xf32>
    %cst_21 = arith.constant 2.000000e+01 : f32
    %40 = vector.broadcast %cst_21 : f32 to vector<2x64xf32>
    %41 = arith.cmpf ogt, %39, %40 : vector<2x64xf32>
    %cst_22 = arith.constant 2.000000e+01 : f32
    %42 = vector.broadcast %cst_22 : f32 to vector<2x64xf32>
    %43 = arith.minimumf %39, %42 : vector<2x64xf32>
    %44 = math.exp %43 : vector<2x64xf32>
    %45 = math.log1p %44 : vector<2x64xf32>
    %46 = arith.select %41, %39, %45 : vector<2x64xi1>, vector<2x64xf32>
    %cst_23 = arith.constant dense<0.000000e+00> : vector<2x6xf32>
    %47 = tpu.matmul %46, %2, %cst_23 {dimension_numbers = #tpu.dot_dimension_numbers<[1], [0], [0], [1], [0, 0, 1, 1], [], []>} : vector<2x64xf32>, vector<64x6xf32>, vector<2x6xf32> -> vector<2x6xf32>
    %48 = arith.addf %47, %11 : vector<2x6xf32>
    %49 = vector.extract_strided_slice %48 {offsets = [0, 0], sizes = [2, 3], strides = [1, 1]} : vector<2x6xf32> to vector<2x3xf32>
    %50 = vector.extract_strided_slice %48 {offsets = [0, 3], sizes = [2, 3], strides = [1, 1]} : vector<2x6xf32> to vector<2x3xf32>
    %51 = arith.addf %34, %49 : vector<2x3xf32>
    %52 = vector.extract_strided_slice %12 {offsets = [1, 0], sizes = [1, 3], strides = [1, 1]} : vector<7x3xf32> to vector<1x3xf32>
    %53 = vector.broadcast %52 : vector<1x3xf32> to vector<2x3xf32>
    %54 = arith.mulf %50, %53 : vector<2x3xf32>
    %55 = arith.addf %51, %54 : vector<2x3xf32>
    %cst_24 = arith.constant dense<0.000000e+00> : vector<2x64xf32>
    %56 = tpu.matmul %55, %0, %cst_24 {dimension_numbers = #tpu.dot_dimension_numbers<[1], [0], [0], [1], [0, 0, 1, 1], [], []>} : vector<2x3xf32>, vector<3x64xf32>, vector<2x64xf32> -> vector<2x64xf32>
    %57 = arith.addf %56, %5 : vector<2x64xf32>
    %58 = math.tanh %57 : vector<2x64xf32>
    %cst_25 = arith.constant dense<0.000000e+00> : vector<2x64xf32>
    %59 = tpu.matmul %58, %1, %cst_25 {dimension_numbers = #tpu.dot_dimension_numbers<[1], [0], [0], [1], [0, 0, 1, 1], [], []>} : vector<2x64xf32>, vector<64x64xf32>, vector<2x64xf32> -> vector<2x64xf32>
    %60 = arith.addf %59, %8 : vector<2x64xf32>
    %cst_26 = arith.constant 2.000000e+01 : f32
    %61 = vector.broadcast %cst_26 : f32 to vector<2x64xf32>
    %62 = arith.cmpf ogt, %60, %61 : vector<2x64xf32>
    %cst_27 = arith.constant 2.000000e+01 : f32
    %63 = vector.broadcast %cst_27 : f32 to vector<2x64xf32>
    %64 = arith.minimumf %60, %63 : vector<2x64xf32>
    %65 = math.exp %64 : vector<2x64xf32>
    %66 = math.log1p %65 : vector<2x64xf32>
    %67 = arith.select %62, %60, %66 : vector<2x64xi1>, vector<2x64xf32>
    %cst_28 = arith.constant dense<0.000000e+00> : vector<2x6xf32>
    %68 = tpu.matmul %67, %2, %cst_28 {dimension_numbers = #tpu.dot_dimension_numbers<[1], [0], [0], [1], [0, 0, 1, 1], [], []>} : vector<2x64xf32>, vector<64x6xf32>, vector<2x6xf32> -> vector<2x6xf32>
    %69 = arith.addf %68, %11 : vector<2x6xf32>
    %70 = vector.extract_strided_slice %69 {offsets = [0, 0], sizes = [2, 3], strides = [1, 1]} : vector<2x6xf32> to vector<2x3xf32>
    %71 = vector.extract_strided_slice %69 {offsets = [0, 3], sizes = [2, 3], strides = [1, 1]} : vector<2x6xf32> to vector<2x3xf32>
    %72 = arith.addf %55, %70 : vector<2x3xf32>
    %73 = vector.extract_strided_slice %12 {offsets = [2, 0], sizes = [1, 3], strides = [1, 1]} : vector<7x3xf32> to vector<1x3xf32>
    %74 = vector.broadcast %73 : vector<1x3xf32> to vector<2x3xf32>
    %75 = arith.mulf %71, %74 : vector<2x3xf32>
    %76 = arith.addf %72, %75 : vector<2x3xf32>
    %cst_29 = arith.constant dense<0.000000e+00> : vector<2x64xf32>
    %77 = tpu.matmul %76, %0, %cst_29 {dimension_numbers = #tpu.dot_dimension_numbers<[1], [0], [0], [1], [0, 0, 1, 1], [], []>} : vector<2x3xf32>, vector<3x64xf32>, vector<2x64xf32> -> vector<2x64xf32>
    %78 = arith.addf %77, %5 : vector<2x64xf32>
    %79 = math.tanh %78 : vector<2x64xf32>
    %cst_30 = arith.constant dense<0.000000e+00> : vector<2x64xf32>
    %80 = tpu.matmul %79, %1, %cst_30 {dimension_numbers = #tpu.dot_dimension_numbers<[1], [0], [0], [1], [0, 0, 1, 1], [], []>} : vector<2x64xf32>, vector<64x64xf32>, vector<2x64xf32> -> vector<2x64xf32>
    %81 = arith.addf %80, %8 : vector<2x64xf32>
    %cst_31 = arith.constant 2.000000e+01 : f32
    %82 = vector.broadcast %cst_31 : f32 to vector<2x64xf32>
    %83 = arith.cmpf ogt, %81, %82 : vector<2x64xf32>
    %cst_32 = arith.constant 2.000000e+01 : f32
    %84 = vector.broadcast %cst_32 : f32 to vector<2x64xf32>
    %85 = arith.minimumf %81, %84 : vector<2x64xf32>
    %86 = math.exp %85 : vector<2x64xf32>
    %87 = math.log1p %86 : vector<2x64xf32>
    %88 = arith.select %83, %81, %87 : vector<2x64xi1>, vector<2x64xf32>
    %cst_33 = arith.constant dense<0.000000e+00> : vector<2x6xf32>
    %89 = tpu.matmul %88, %2, %cst_33 {dimension_numbers = #tpu.dot_dimension_numbers<[1], [0], [0], [1], [0, 0, 1, 1], [], []>} : vector<2x64xf32>, vector<64x6xf32>, vector<2x6xf32> -> vector<2x6xf32>
    %90 = arith.addf %89, %11 : vector<2x6xf32>
    %91 = vector.extract_strided_slice %90 {offsets = [0, 0], sizes = [2, 3], strides = [1, 1]} : vector<2x6xf32> to vector<2x3xf32>
    %92 = vector.extract_strided_slice %90 {offsets = [0, 3], sizes = [2, 3], strides = [1, 1]} : vector<2x6xf32> to vector<2x3xf32>
    %93 = arith.addf %76, %91 : vector<2x3xf32>
    %94 = vector.extract_strided_slice %12 {offsets = [3, 0], sizes = [1, 3], strides = [1, 1]} : vector<7x3xf32> to vector<1x3xf32>
    %95 = vector.broadcast %94 : vector<1x3xf32> to vector<2x3xf32>
    %96 = arith.mulf %92, %95 : vector<2x3xf32>
    %97 = arith.addf %93, %96 : vector<2x3xf32>
    %cst_34 = arith.constant dense<0.000000e+00> : vector<2x64xf32>
    %98 = tpu.matmul %97, %0, %cst_34 {dimension_numbers = #tpu.dot_dimension_numbers<[1], [0], [0], [1], [0, 0, 1, 1], [], []>} : vector<2x3xf32>, vector<3x64xf32>, vector<2x64xf32> -> vector<2x64xf32>
    %99 = arith.addf %98, %5 : vector<2x64xf32>
    %100 = math.tanh %99 : vector<2x64xf32>
    %cst_35 = arith.constant dense<0.000000e+00> : vector<2x64xf32>
    %101 = tpu.matmul %100, %1, %cst_35 {dimension_numbers = #tpu.dot_dimension_numbers<[1], [0], [0], [1], [0, 0, 1, 1], [], []>} : vector<2x64xf32>, vector<64x64xf32>, vector<2x64xf32> -> vector<2x64xf32>
    %102 = arith.addf %101, %8 : vector<2x64xf32>
    %cst_36 = arith.constant 2.000000e+01 : f32
    %103 = vector.broadcast %cst_36 : f32 to vector<2x64xf32>
    %104 = arith.cmpf ogt, %102, %103 : vector<2x64xf32>
    %cst_37 = arith.constant 2.000000e+01 : f32
    %105 = vector.broadcast %cst_37 : f32 to vector<2x64xf32>
    %106 = arith.minimumf %102, %105 : vector<2x64xf32>
    %107 = math.exp %106 : vector<2x64xf32>
    %108 = math.log1p %107 : vector<2x64xf32>
    %109 = arith.select %104, %102, %108 : vector<2x64xi1>, vector<2x64xf32>
    %cst_38 = arith.constant dense<0.000000e+00> : vector<2x6xf32>
    %110 = tpu.matmul %109, %2, %cst_38 {dimension_numbers = #tpu.dot_dimension_numbers<[1], [0], [0], [1], [0, 0, 1, 1], [], []>} : vector<2x64xf32>, vector<64x6xf32>, vector<2x6xf32> -> vector<2x6xf32>
    %111 = arith.addf %110, %11 : vector<2x6xf32>
    %112 = vector.extract_strided_slice %111 {offsets = [0, 0], sizes = [2, 3], strides = [1, 1]} : vector<2x6xf32> to vector<2x3xf32>
    %113 = vector.extract_strided_slice %111 {offsets = [0, 3], sizes = [2, 3], strides = [1, 1]} : vector<2x6xf32> to vector<2x3xf32>
    %114 = arith.addf %97, %112 : vector<2x3xf32>
    %115 = vector.extract_strided_slice %12 {offsets = [4, 0], sizes = [1, 3], strides = [1, 1]} : vector<7x3xf32> to vector<1x3xf32>
    %116 = vector.broadcast %115 : vector<1x3xf32> to vector<2x3xf32>
    %117 = arith.mulf %113, %116 : vector<2x3xf32>
    %118 = arith.addf %114, %117 : vector<2x3xf32>
    %cst_39 = arith.constant dense<0.000000e+00> : vector<2x64xf32>
    %119 = tpu.matmul %118, %0, %cst_39 {dimension_numbers = #tpu.dot_dimension_numbers<[1], [0], [0], [1], [0, 0, 1, 1], [], []>} : vector<2x3xf32>, vector<3x64xf32>, vector<2x64xf32> -> vector<2x64xf32>
    %120 = arith.addf %119, %5 : vector<2x64xf32>
    %121 = math.tanh %120 : vector<2x64xf32>
    %cst_40 = arith.constant dense<0.000000e+00> : vector<2x64xf32>
    %122 = tpu.matmul %121, %1, %cst_40 {dimension_numbers = #tpu.dot_dimension_numbers<[1], [0], [0], [1], [0, 0, 1, 1], [], []>} : vector<2x64xf32>, vector<64x64xf32>, vector<2x64xf32> -> vector<2x64xf32>
    %123 = arith.addf %122, %8 : vector<2x64xf32>
    %cst_41 = arith.constant 2.000000e+01 : f32
    %124 = vector.broadcast %cst_41 : f32 to vector<2x64xf32>
    %125 = arith.cmpf ogt, %123, %124 : vector<2x64xf32>
    %cst_42 = arith.constant 2.000000e+01 : f32
    %126 = vector.broadcast %cst_42 : f32 to vector<2x64xf32>
    %127 = arith.minimumf %123, %126 : vector<2x64xf32>
    %128 = math.exp %127 : vector<2x64xf32>
    %129 = math.log1p %128 : vector<2x64xf32>
    %130 = arith.select %125, %123, %129 : vector<2x64xi1>, vector<2x64xf32>
    %cst_43 = arith.constant dense<0.000000e+00> : vector<2x6xf32>
    %131 = tpu.matmul %130, %2, %cst_43 {dimension_numbers = #tpu.dot_dimension_numbers<[1], [0], [0], [1], [0, 0, 1, 1], [], []>} : vector<2x64xf32>, vector<64x6xf32>, vector<2x6xf32> -> vector<2x6xf32>
    %132 = arith.addf %131, %11 : vector<2x6xf32>
    %133 = vector.extract_strided_slice %132 {offsets = [0, 0], sizes = [2, 3], strides = [1, 1]} : vector<2x6xf32> to vector<2x3xf32>
    %134 = vector.extract_strided_slice %132 {offsets = [0, 3], sizes = [2, 3], strides = [1, 1]} : vector<2x6xf32> to vector<2x3xf32>
    %135 = arith.addf %118, %133 : vector<2x3xf32>
    %136 = vector.extract_strided_slice %12 {offsets = [5, 0], sizes = [1, 3], strides = [1, 1]} : vector<7x3xf32> to vector<1x3xf32>
    %137 = vector.broadcast %136 : vector<1x3xf32> to vector<2x3xf32>
    %138 = arith.mulf %134, %137 : vector<2x3xf32>
    %139 = arith.addf %135, %138 : vector<2x3xf32>
    %cst_44 = arith.constant dense<0.000000e+00> : vector<2x64xf32>
    %140 = tpu.matmul %139, %0, %cst_44 {dimension_numbers = #tpu.dot_dimension_numbers<[1], [0], [0], [1], [0, 0, 1, 1], [], []>} : vector<2x3xf32>, vector<3x64xf32>, vector<2x64xf32> -> vector<2x64xf32>
    %141 = arith.addf %140, %5 : vector<2x64xf32>
    %142 = math.tanh %141 : vector<2x64xf32>
    %cst_45 = arith.constant dense<0.000000e+00> : vector<2x64xf32>
    %143 = tpu.matmul %142, %1, %cst_45 {dimension_numbers = #tpu.dot_dimension_numbers<[1], [0], [0], [1], [0, 0, 1, 1], [], []>} : vector<2x64xf32>, vector<64x64xf32>, vector<2x64xf32> -> vector<2x64xf32>
    %144 = arith.addf %143, %8 : vector<2x64xf32>
    %cst_46 = arith.constant 2.000000e+01 : f32
    %145 = vector.broadcast %cst_46 : f32 to vector<2x64xf32>
    %146 = arith.cmpf ogt, %144, %145 : vector<2x64xf32>
    %cst_47 = arith.constant 2.000000e+01 : f32
    %147 = vector.broadcast %cst_47 : f32 to vector<2x64xf32>
    %148 = arith.minimumf %144, %147 : vector<2x64xf32>
    %149 = math.exp %148 : vector<2x64xf32>
    %150 = math.log1p %149 : vector<2x64xf32>
    %151 = arith.select %146, %144, %150 : vector<2x64xi1>, vector<2x64xf32>
    %cst_48 = arith.constant dense<0.000000e+00> : vector<2x6xf32>
    %152 = tpu.matmul %151, %2, %cst_48 {dimension_numbers = #tpu.dot_dimension_numbers<[1], [0], [0], [1], [0, 0, 1, 1], [], []>} : vector<2x64xf32>, vector<64x6xf32>, vector<2x6xf32> -> vector<2x6xf32>
    %153 = arith.addf %152, %11 : vector<2x6xf32>
    %154 = vector.extract_strided_slice %153 {offsets = [0, 0], sizes = [2, 3], strides = [1, 1]} : vector<2x6xf32> to vector<2x3xf32>
    %155 = vector.extract_strided_slice %153 {offsets = [0, 3], sizes = [2, 3], strides = [1, 1]} : vector<2x6xf32> to vector<2x3xf32>
    %156 = arith.addf %139, %154 : vector<2x3xf32>
    %157 = vector.extract_strided_slice %12 {offsets = [6, 0], sizes = [1, 3], strides = [1, 1]} : vector<7x3xf32> to vector<1x3xf32>
    %158 = vector.broadcast %157 : vector<1x3xf32> to vector<2x3xf32>
    %159 = arith.mulf %155, %158 : vector<2x3xf32>
    %160 = arith.addf %156, %159 : vector<2x3xf32>
    %c0_49 = arith.constant 0 : index
    %c0_50 = arith.constant 0 : index
    %161 = vector.load %arg8[%c0_49, %c0_50] : memref<2x3xf32, #tpu.memory_space<vmem>>, vector<2x3xf32>
    tpu.vector_store %arg8[%c0_49, %c0_50], %160 {strides = array<i32>} : memref<2x3xf32, #tpu.memory_space<vmem>>, vector<2x3xf32>,
    return
  }
}

</mosaic_0001>

<bundles_post_ra>
// kernel: tpu_custom_call.1
= control target key start
LH: loop header
LB: loop body
LE: loop exit
PB: predicated region body
PF: predicated region fallthrough
CT: control target
= control target key end

     0   :  { %vm74_vm0 = vcmask 1042432   ;;  %vm70_vm1 = vcmask 23552   ;;  %v2376_v1 = vmov 0.0   ;;  %vm2377_vm2 = vmmov 0   ;;  %s2920_s0 = inlined_call_operand.vmem [shape: f32[7,3], index: 0, kind: input, shape index: {}]   ;;  %s2921_s1 = inlined_call_operand.vmem [shape: f32[2,3], index: 1, kind: input, shape index: {}]   ;;  %s2922_s2 = inlined_call_operand.vmem [shape: f32[3,64], index: 2, kind: input, shape index: {}]   ;;  %s2923_s3 = inlined_call_operand.vmem [shape: f32[1,64], index: 3, kind: input, shape index: {}]   ;;  %s2924_s4 = inlined_call_operand.vmem [shape: f32[64,64], index: 4, kind: input, shape index: {}]   ;;  %s2925_s5 = inlined_call_operand.vmem [shape: f32[1,64], index: 5, kind: input, shape index: {}]   ;;  %s2926_s6 = inlined_call_operand.vmem [shape: f32[64,6], index: 6, kind: input, shape index: {}]   ;;  %s2927_s7 = inlined_call_operand.vmem [shape: f32[1,6], index: 7, kind: input, shape index: {}]   ;;  %s2928_s8 = inlined_call_operand.hbm [shape: f32[2,3], index: 8, kind: output, shape index: {}]  }
   0x1   :  { %v2429_v0 = vld [vmem:[%s2922_s2] sm:$0x7]  ;;  %2006 = vmatprep.subr.mxu0 %v2376_v1  ;;  %2008 = vmatprep.mubr.msk.f32.mxu0 %vm2377_vm2, %v2376_v1 }
   0x2   :  { %v2437_v2 = vld [vmem:[%s2921_s1] sm:$0x3] }
   0x3   :  { %13 = vsyncpa [#allocation3], 0  ;;  %2007 = vmatpush3.msk.msra.mxu0 %vm74_vm0, %v2429_v0  ;;  %2011 = vmatprep.subr.mxu1 %v2376_v1  ;;  %v2452_v3 = vld [vmem:[%s2924_s4 + $0x38] sm:$0xff]  ;;  %v2459_v4 = vld [vmem:[%s2924_s4 + $0x30] sm:$0xff]  ;;  %vm149_vm3 = vcmask 523264   ;;  %v311_v24 = vlaneseq  ;;  %s2378_s17 = smov 3  }
   0x4   :  { %2009 = vmatmul.mubr.msk.f32.vlgmr.msra.gmra.mxu0 %vm70_vm1, %v2437_v2  ;;  %2027 = vmatprep.mubr.msk.f32.mxu1 %vm2377_vm2, %v2376_v1  ;;  %v2464_v5 = vld [vmem:[%s2924_s4 + $0x28] sm:$0xff]  ;;  %v2471_v6 = vld [vmem:[%s2924_s4 + $0x20] sm:$0xff]  ;;  %v2478_v7 = vld [vmem:[%s2924_s4 + $0x18] sm:$0xff]  ;;  %s2379_s19 = smov 125  }
   0x5   :  { %2030 = vmatprep.subr.mxu0 %v2376_v1  ;;  %2046 = vmatprep.mubr.msk.f32.mxu0 %vm2377_vm2, %v2376_v1  ;;  %v2485_v8 = vld [vmem:[%s2924_s4 + $0x10] sm:$0xff]  ;;  %v2492_v9 = vld [vmem:[%s2924_s4 + $0x8] sm:$0xff]  ;;  %v2499_v10 = vld [vmem:[%s2924_s4] sm:$0xff]  ;;  %v2573_v25 = vshrl.u32 %v311_v24, 7 }
   0x6   :  { %2012 = vmatpush3.msra.mxu1 %v2452_v3  ;;  %v2508_v11 = vld [vmem:[%s2923_s3] ss:$0 sm:$0xff]  ;;  %v2520_v16 = vld [vmem:[%s2926_s6 + $0x38] sm:$0xff]  ;;  %v2527_v17 = vld [vmem:[%s2926_s6 + $0x30] sm:$0xff] }
   0x7   :  { %2013 = vmatprep.subr.mxu1 %v2376_v1  ;;  %2031 = vmatpush3.msra.mxu0 %v2520_v16  ;;  %v2534_v18 = vld [vmem:[%s2926_s6 + $0x28] sm:$0xff]  ;;  %v2541_v19 = vld [vmem:[%s2926_s6 + $0x20] sm:$0xff]  ;;  %v2548_v20 = vld [vmem:[%s2926_s6 + $0x18] sm:$0xff]  ;;  %v313_v27 = vsub.s32 0, %v2573_v25  ;;  %v562_v58 = vsub.s32 1, %v2573_v25 }
   0x8   :  { %2014 = vmatpush3.msra.mxu1 %v2459_v4  ;;  %2032 = vmatprep.subr.mxu0 %v2376_v1  ;;  %v2555_v21 = vld [vmem:[%s2926_s6 + $0x10] sm:$0xff]  ;;  %v2562_v22 = vld [vmem:[%s2926_s6 + $0x8] sm:$0xff]  ;;  %v2569_v23 = vld [vmem:[%s2926_s6] sm:$0xff] }
   0x9   :  { %2015 = vmatprep.subr.mxu1 %v2376_v1  ;;  %2033 = vmatpush3.msra.mxu0 %v2527_v17  ;;  %v2578_v26 = vld [vmem:[%s2920_s0] sm:$0x7f] }
   0xa   :  { %2016 = vmatpush3.msra.mxu1 %v2464_v5  ;;  %2034 = vmatprep.subr.mxu0 %v2376_v1  ;;  %v314_v28 = vrot.slane %v2578_v26, %v313_v27  ;;  %v2586_v29 = vld [vmem:[%s2925_s5] ss:$0 sm:$0xff]  ;;  %v563_v59 = vrot.slane %v2578_v26, %v562_v58 }
   0xb   :  { %2017 = vmatprep.subr.mxu1 %v2376_v1  ;;  %2035 = vmatpush3.msra.mxu0 %v2534_v18  ;;  %v2611_v45 = vld [vmem:[%s2927_s7] ss:$0 sm:$0xff]  ;;  %s2380_s7 = smov [#allocation2]  }
   0xc   :  { %2018 = vmatpush3.msra.mxu1 %v2471_v6  ;;  %2036 = vmatprep.subr.mxu0 %v2376_v1  ;;  %s1827_s20 = sshll.u32 %s2380_s7, 4  ;;  %s1828_s20 = int_to_ptr.vmem [resolvable:$true] %s1827_s20 }
   0xd   :  { %2019 = vmatprep.subr.mxu1 %v2376_v1  ;;  %2037 = vmatpush3.msra.mxu0 %v2541_v19  ;;  %s2354_s21 = scalar_lea.vmem %s1828_s20, 32  ;;  %p2359_p1 = scmp.lt.s32.totalorder %s1828_s20, %s1828_s20 }
   0xe   :  { %2020 = vmatpush3.msra.mxu1 %v2478_v7  ;;  %2038 = vmatprep.subr.mxu0 %v2376_v1  ;;  %p2355_p0 = scmp.ne.s32.totalorder %s1828_s20, %s2354_s21  ;;  %p2360_p2 = scmp.lt.s32.totalorder %s2354_s21, %s2354_s21 }
   0xf   :  { %2021 = vmatprep.subr.mxu1 %v2376_v1  ;;  %2039 = vmatpush3.msra.mxu0 %v2548_v20 }
  0x10   :  { %2022 = vmatpush3.msra.mxu1 %v2485_v8  ;;  %2040 = vmatprep.subr.mxu0 %v2376_v1  ;;  %p2361_p3 = por %p2360_p2, %p2359_p1 }
  0x11   :  { %2023 = vmatprep.subr.mxu1 %v2376_v1  ;;  %2041 = vmatpush3.msra.mxu0 %v2555_v21 }
  0x12   :  { %2024 = vmatpush3.msra.mxu1 %v2492_v9  ;;  %2042 = vmatprep.subr.mxu0 %v2376_v1  ;;  %p2362_p4 = pnand %p2361_p3, %p2355_p0 }
  0x13   :  { %2025 = vmatprep.subr.mxu1 %v2376_v1  ;;  %2043 = vmatpush3.msra.mxu0 %v2562_v22 }
  0x14   :  { %2026 = vmatpush3.msra.mxu1 %v2499_v10  ;;  %2044 = vmatprep.subr.mxu0 %v2376_v1 }
  0x15   :  { %2049 = vmatprep.subr.mxu1 %v2376_v1  ;;  %2045 = vmatpush3.msra.mxu0 %v2569_v23 }
  0x16   :  { %2054 = vmatprep.subr.mxu0 %v2376_v1  ;;  %316 = vrot.lane.b32.xlu0 %v314_v28, %s2378_s17 }
  0x17   :  { %565 = vrot.lane.b32.xlu1 %v563_v59, %s2378_s17 }
  0x88   :  { %v317_v47 = vpop.permute.xlu0 %316 }
  0xc4   :  { %v144_v12 = vpop.f32.mrf.mxu0 }
  0xc5   :  { %v145_v13 = vadd.f32 %v2508_v11, %v144_v12 }
  0xc6   :  { %v2010_v14 = vpop.f32.mrf.mxu0 }
  0xc7   :  { %2312 = vtanh.f32 %v145_v13 }
  0xd4   :  { %v2313_v15 = vpop.eup %2312 }
  0xd5   :  { %2028 = vmatmul.mubr.msk.f32.vlgmr.msra.gmra.mxu1 %vm149_vm3, %v2313_v15 }
  0xd6   :  { %2050 = vmatpush3.msk.msra.mxu1 %vm74_vm0, %v2429_v0  ;;  %2051 = vmatprep.mubr.msk.f32.mxu1 %vm2377_vm2, %v2376_v1 }
  0xd7   :  { %2073 = vmatprep.subr.mxu1 %v2376_v1 }
 0x195   :  { %v219_v30 = vpop.f32.mrf.mxu1 }
 0x196   :  { %v220_v31 = vadd.f32 %v2586_v29, %v219_v30 }
 0x197   :  { %v2029_v32 = vpop.f32.mrf.mxu1 }
 0x198   :  { %v224_v33 = vmin.f32 %v220_v31, 20.0  ;;  %vm223_vm5 = vcmp.gt.f32.partialorder %v220_v31, 20.0 }
 0x19a   :  { %v225_v34 = vmul.f32 1.442695, %v224_v33 }
 0x19c   :  { %2314 = vpow2.f32 %v225_v34  ;;  %v566_v34 = vpop.permute.xlu1 %565 }
 0x1a9   :  { %v2315_v35 = vpop.eup %2314 }
 0x1aa   :  { %v227_v36 = vadd.f32 1.0, %v2315_v35  ;;  %v230_v37 = vmul.f32 -0.5, %v2315_v35  ;;  %v233_v39 = vand.u32 2147483647, %v2315_v35 }
 0x1ac   :  { %2316 = vlog2.f32 %v227_v36  ;;  %v231_v38 = vadd.f32 1.0, %v230_v37  ;;  %vm234_vm4 = vcmp.lt.f32.partialorder %v233_v39, 0.0004427343 }
 0x1ae   :  { %v232_v42 = vmul.f32 %v2315_v35, %v231_v38 }
 0x1b9   :  { %v2317_v40 = vpop.eup %2316 }
 0x1ba   :  { %v229_v41 = vmul.f32 0.6931472, %v2317_v40 }
 0x1bc   :  { %v235_v43 = vsel %vm234_vm4, %v232_v42, %v229_v41 }
 0x1bd   :  { %v236_v44 = vsel %vm223_vm5, %v220_v31, %v235_v43 }
 0x1be   :  { %2047 = vmatmul.mubr.msk.f32.vlgmr.msra.gmra.mxu0 %vm149_vm3, %v236_v44 }
 0x1bf   :  { %2055 = vmatpush3.msra.mxu0 %v2452_v3  ;;  %2070 = vmatprep.mubr.msk.f32.mxu0 %vm2377_vm2, %v2376_v1 }
 0x1c0   :  { %2056 = vmatprep.subr.mxu0 %v2376_v1 }
 0x1c1   :  { %2057 = vmatpush3.msra.mxu0 %v2459_v4 }
 0x1c2   :  { %2058 = vmatprep.subr.mxu0 %v2376_v1 }
 0x1c3   :  { %2059 = vmatpush3.msra.mxu0 %v2464_v5 }
 0x1c4   :  { %2060 = vmatprep.subr.mxu0 %v2376_v1 }
 0x1c5   :  { %2061 = vmatpush3.msra.mxu0 %v2471_v6 }
 0x1c6   :  { %2062 = vmatprep.subr.mxu0 %v2376_v1 }
 0x1c7   :  { %2063 = vmatpush3.msra.mxu0 %v2478_v7 }
 0x1c8   :  { %2064 = vmatprep.subr.mxu0 %v2376_v1 }
 0x1c9   :  { %2065 = vmatpush3.msra.mxu0 %v2485_v8 }
 0x1ca   :  { %2066 = vmatprep.subr.mxu0 %v2376_v1 }
 0x1cb   :  { %2067 = vmatpush3.msra.mxu0 %v2492_v9 }
 0x1cc   :  { %2068 = vmatprep.subr.mxu0 %v2376_v1 }
 0x1cd   :  { %2069 = vmatpush3.msra.mxu0 %v2499_v10 }
 0x1ce   :  { %2092 = vmatprep.subr.mxu0 %v2376_v1 }
 0x27e   :  { %v306_v46 = vpop.f32.mrf.mxu0 }
 0x27f   :  { %v307_v48 = vadd.f32 %v2611_v45, %v306_v46  ;;  %v811_v46 = vsub.s32 2, %v2573_v25 }
 0x280   :  { %v2048_v49 = vpop.f32.mrf.mxu0 }
 0x281   :  { %v319_v50 = vmul.f32 %v317_v47, %v307_v48  ;;  %v310_v51 = vadd.f32 %v307_v48, %v2437_v2  ;;  %v812_v47 = vrot.slane %v2578_v26, %v811_v46 }
 0x283   :  { %321 = vrot.lane.b32.xlu0 %v319_v50, %s2379_s19 }
 0x287   :  { %814 = vrot.lane.b32.xlu0 %v812_v47, %s2378_s17 }
 0x2f5   :  { %v322_v52 = vpop.permute.xlu0 %321 }
 0x2f6   :  { %v2616_v53 = vadd.f32 %v322_v52, %v310_v51 }
 0x2f8   :  { %2052 = vmatmul.mubr.msk.f32.vlgmr.msra.gmra.mxu1 %vm70_vm1, %v2616_v53 }
 0x2f9   :  { %2074 = vmatpush3.msra.mxu1 %v2520_v16  ;;  %2089 = vmatprep.mubr.msk.f32.mxu1 %vm2377_vm2, %v2376_v1 }
 0x2fa   :  { %2075 = vmatprep.subr.mxu1 %v2376_v1 }
 0x2fb   :  { %2076 = vmatpush3.msra.mxu1 %v2527_v17 }
 0x2fc   :  { %2077 = vmatprep.subr.mxu1 %v2376_v1 }
 0x2fd   :  { %2078 = vmatpush3.msra.mxu1 %v2534_v18 }
 0x2fe   :  { %2079 = vmatprep.subr.mxu1 %v2376_v1 }
 0x2ff   :  { %2080 = vmatpush3.msra.mxu1 %v2541_v19 }
 0x300   :  { %2081 = vmatprep.subr.mxu1 %v2376_v1 }
 0x301   :  { %2082 = vmatpush3.msra.mxu1 %v2548_v20 }
 0x302   :  { %2083 = vmatprep.subr.mxu1 %v2376_v1 }
 0x303   :  { %2084 = vmatpush3.msra.mxu1 %v2555_v21 }
 0x304   :  { %2085 = vmatprep.subr.mxu1 %v2376_v1 }
 0x305   :  { %2086 = vmatpush3.msra.mxu1 %v2562_v22 }
 0x306   :  { %2087 = vmatprep.subr.mxu1 %v2376_v1 }
 0x307   :  { %2088 = vmatpush3.msra.mxu1 %v2569_v23 }
 0x308   :  { %2097 = vmatprep.subr.mxu1 %v2376_v1 }
 0x3b8   :  { %v394_v54 = vpop.f32.mrf.mxu1 }
 0x3b9   :  { %v395_v55 = vadd.f32 %v2508_v11, %v394_v54 }
 0x3ba   :  { %v2053_v56 = vpop.f32.mrf.mxu1 }
 0x3bb   :  { %2318 = vtanh.f32 %v395_v55 }
 0x3c8   :  { %v2319_v57 = vpop.eup %2318 }
 0x3c9   :  { %2071 = vmatmul.mubr.msk.f32.vlgmr.msra.gmra.mxu0 %vm149_vm3, %v2319_v57 }
 0x3ca   :  { %2093 = vmatpush3.msk.msra.mxu0 %vm74_vm0, %v2429_v0  ;;  %2094 = vmatprep.mubr.msk.f32.mxu0 %vm2377_vm2, %v2376_v1 }
 0x3cb   :  { %2116 = vmatprep.subr.mxu0 %v2376_v1 }
 0x489   :  { %v468_v60 = vpop.f32.mrf.mxu0 }
 0x48a   :  { %v469_v61 = vadd.f32 %v2586_v29, %v468_v60 }
 0x48b   :  { %v2072_v62 = vpop.f32.mrf.mxu0 }
 0x48c   :  { %v473_v63 = vmin.f32 %v469_v61, 20.0  ;;  %vm472_vm7 = vcmp.gt.f32.partialorder %v469_v61, 20.0 }
 0x48e   :  { %v474_v2 = vmul.f32 1.442695, %v473_v63 }
 0x490   :  { %2320 = vpow2.f32 %v474_v2  ;;  %v815_v2 = vpop.permute.xlu0 %814 }
 0x49d   :  { %v2321_v12 = vpop.eup %2320 }
 0x49e   :  { %v476_v13 = vadd.f32 1.0, %v2321_v12  ;;  %v479_v14 = vmul.f32 -0.5, %v2321_v12  ;;  %v482_v24 = vand.u32 2147483647, %v2321_v12 }
 0x4a0   :  { %2322 = vlog2.f32 %v476_v13  ;;  %v480_v15 = vadd.f32 1.0, %v479_v14  ;;  %vm483_vm6 = vcmp.lt.f32.partialorder %v482_v24, 0.0004427343 }
 0x4a2   :  { %v481_v30 = vmul.f32 %v2321_v12, %v480_v15 }
 0x4ad   :  { %v2323_v27 = vpop.eup %2322 }
 0x4ae   :  { %v478_v28 = vmul.f32 0.6931472, %v2323_v27 }
 0x4b0   :  { %v484_v31 = vsel %vm483_vm6, %v481_v30, %v478_v28 }
 0x4b1   :  { %v485_v32 = vsel %vm472_vm7, %v469_v61, %v484_v31 }
 0x4b2   :  { %2090 = vmatmul.mubr.msk.f32.vlgmr.msra.gmra.mxu1 %vm149_vm3, %v485_v32 }
 0x4b3   :  { %2098 = vmatpush3.msra.mxu1 %v2452_v3  ;;  %2113 = vmatprep.mubr.msk.f32.mxu1 %vm2377_vm2, %v2376_v1 }
 0x4b4   :  { %2099 = vmatprep.subr.mxu1 %v2376_v1 }
 0x4b5   :  { %2100 = vmatpush3.msra.mxu1 %v2459_v4 }
 0x4b6   :  { %2101 = vmatprep.subr.mxu1 %v2376_v1 }
 0x4b7   :  { %2102 = vmatpush3.msra.mxu1 %v2464_v5 }
 0x4b8   :  { %2103 = vmatprep.subr.mxu1 %v2376_v1 }
 0x4b9   :  { %2104 = vmatpush3.msra.mxu1 %v2471_v6 }
 0x4ba   :  { %2105 = vmatprep.subr.mxu1 %v2376_v1 }
 0x4bb   :  { %2106 = vmatpush3.msra.mxu1 %v2478_v7 }
 0x4bc   :  { %2107 = vmatprep.subr.mxu1 %v2376_v1 }
 0x4bd   :  { %2108 = vmatpush3.msra.mxu1 %v2485_v8 }
 0x4be   :  { %2109 = vmatprep.subr.mxu1 %v2376_v1 }
 0x4bf   :  { %2110 = vmatpush3.msra.mxu1 %v2492_v9 }
 0x4c0   :  { %2111 = vmatprep.subr.mxu1 %v2376_v1 }
 0x4c1   :  { %2112 = vmatpush3.msra.mxu1 %v2499_v10 }
 0x4c2   :  { %2135 = vmatprep.subr.mxu1 %v2376_v1 }
 0x572   :  { %v555_v33 = vpop.f32.mrf.mxu1 }
 0x573   :  { %v556_v35 = vadd.f32 %v2611_v45, %v555_v33  ;;  %v1060_v33 = vsub.s32 3, %v2573_v25 }
 0x574   :  { %v2091_v36 = vpop.f32.mrf.mxu1 }
 0x575   :  { %v568_v37 = vmul.f32 %v566_v34, %v556_v35  ;;  %v559_v38 = vadd.f32 %v556_v35, %v2616_v53  ;;  %v1061_v34 = vrot.slane %v2578_v26, %v1060_v33 }
 0x577   :  { %570 = vrot.lane.b32.xlu1 %v568_v37, %s2379_s19  ;;  %1063 = vrot.lane.b32.xlu0 %v1061_v34, %s2378_s17 }
 0x5e9   :  { %v571_v39 = vpop.permute.xlu1 %570 }
 0x5ea   :  { %v2671_v40 = vadd.f32 %v571_v39, %v559_v38 }
 0x5ec   :  { %2095 = vmatmul.mubr.msk.f32.vlgmr.msra.gmra.mxu0 %vm70_vm1, %v2671_v40 }
 0x5ed   :  { %2117 = vmatpush3.msra.mxu0 %v2520_v16  ;;  %2132 = vmatprep.mubr.msk.f32.mxu0 %vm2377_vm2, %v2376_v1 }
 0x5ee   :  { %2118 = vmatprep.subr.mxu0 %v2376_v1 }
 0x5ef   :  { %2119 = vmatpush3.msra.mxu0 %v2527_v17 }
 0x5f0   :  { %2120 = vmatprep.subr.mxu0 %v2376_v1 }
 0x5f1   :  { %2121 = vmatpush3.msra.mxu0 %v2534_v18 }
 0x5f2   :  { %2122 = vmatprep.subr.mxu0 %v2376_v1 }
 0x5f3   :  { %2123 = vmatpush3.msra.mxu0 %v2541_v19 }
 0x5f4   :  { %2124 = vmatprep.subr.mxu0 %v2376_v1 }
 0x5f5   :  { %2125 = vmatpush3.msra.mxu0 %v2548_v20 }
 0x5f6   :  { %2126 = vmatprep.subr.mxu0 %v2376_v1 }
 0x5f7   :  { %2127 = vmatpush3.msra.mxu0 %v2555_v21 }
 0x5f8   :  { %2128 = vmatprep.subr.mxu0 %v2376_v1 }
 0x5f9   :  { %2129 = vmatpush3.msra.mxu0 %v2562_v22 }
 0x5fa   :  { %2130 = vmatprep.subr.mxu0 %v2376_v1 }
 0x5fb   :  { %2131 = vmatpush3.msra.mxu0 %v2569_v23 }
 0x5fc   :  { %2140 = vmatprep.subr.mxu0 %v2376_v1 }
 0x6ac   :  { %v643_v41 = vpop.f32.mrf.mxu0 }
 0x6ad   :  { %v644_v42 = vadd.f32 %v2508_v11, %v643_v41 }
 0x6ae   :  { %v2096_v43 = vpop.f32.mrf.mxu0 }
 0x6af   :  { %2324 = vtanh.f32 %v644_v42 }
 0x6bc   :  { %v2325_v44 = vpop.eup %2324 }
 0x6bd   :  { %2114 = vmatmul.mubr.msk.f32.vlgmr.msra.gmra.mxu1 %vm149_vm3, %v2325_v44 }
 0x6be   :  { %2136 = vmatpush3.msk.msra.mxu1 %vm74_vm0, %v2429_v0  ;;  %2137 = vmatprep.mubr.msk.f32.mxu1 %vm2377_vm2, %v2376_v1 }
 0x6bf   :  { %2159 = vmatprep.subr.mxu1 %v2376_v1 }
 0x77d   :  { %v717_v48 = vpop.f32.mrf.mxu1 }
 0x77e   :  { %v718_v49 = vadd.f32 %v2586_v29, %v717_v48 }
 0x77f   :  { %v2115_v50 = vpop.f32.mrf.mxu1 }
 0x780   :  { %v722_v51 = vmin.f32 %v718_v49, 20.0  ;;  %vm721_vm9 = vcmp.gt.f32.partialorder %v718_v49, 20.0 }
 0x782   :  { %v723_v52 = vmul.f32 1.442695, %v722_v51 }
 0x784   :  { %2326 = vpow2.f32 %v723_v52  ;;  %v1064_v52 = vpop.permute.xlu0 %1063 }
 0x791   :  { %v2327_v53 = vpop.eup %2326 }
 0x792   :  { %v725_v54 = vadd.f32 1.0, %v2327_v53  ;;  %v728_v55 = vmul.f32 -0.5, %v2327_v53  ;;  %v731_v57 = vand.u32 2147483647, %v2327_v53 }
 0x794   :  { %2328 = vlog2.f32 %v725_v54  ;;  %v729_v56 = vadd.f32 1.0, %v728_v55  ;;  %vm732_vm8 = vcmp.lt.f32.partialorder %v731_v57, 0.0004427343 }
 0x796   :  { %v730_v60 = vmul.f32 %v2327_v53, %v729_v56 }
 0x7a1   :  { %v2329_v58 = vpop.eup %2328 }
 0x7a2   :  { %v727_v59 = vmul.f32 0.6931472, %v2329_v58 }
 0x7a4   :  { %v733_v61 = vsel %vm732_vm8, %v730_v60, %v727_v59 }
 0x7a5   :  { %v734_v62 = vsel %vm721_vm9, %v718_v49, %v733_v61 }
 0x7a6   :  { %2133 = vmatmul.mubr.msk.f32.vlgmr.msra.gmra.mxu0 %vm149_vm3, %v734_v62 }
 0x7a7   :  { %2141 = vmatpush3.msra.mxu0 %v2452_v3  ;;  %2156 = vmatprep.mubr.msk.f32.mxu0 %vm2377_vm2, %v2376_v1 }
 0x7a8   :  { %2142 = vmatprep.subr.mxu0 %v2376_v1 }
 0x7a9   :  { %2143 = vmatpush3.msra.mxu0 %v2459_v4 }
 0x7aa   :  { %2144 = vmatprep.subr.mxu0 %v2376_v1 }
 0x7ab   :  { %2145 = vmatpush3.msra.mxu0 %v2464_v5 }
 0x7ac   :  { %2146 = vmatprep.subr.mxu0 %v2376_v1 }
 0x7ad   :  { %2147 = vmatpush3.msra.mxu0 %v2471_v6 }
 0x7ae   :  { %2148 = vmatprep.subr.mxu0 %v2376_v1 }
 0x7af   :  { %2149 = vmatpush3.msra.mxu0 %v2478_v7 }
 0x7b0   :  { %2150 = vmatprep.subr.mxu0 %v2376_v1 }
 0x7b1   :  { %2151 = vmatpush3.msra.mxu0 %v2485_v8 }
 0x7b2   :  { %2152 = vmatprep.subr.mxu0 %v2376_v1 }
 0x7b3   :  { %2153 = vmatpush3.msra.mxu0 %v2492_v9 }
 0x7b4   :  { %2154 = vmatprep.subr.mxu0 %v2376_v1 }
 0x7b5   :  { %2155 = vmatpush3.msra.mxu0 %v2499_v10 }
 0x7b6   :  { %2178 = vmatprep.subr.mxu0 %v2376_v1 }
 0x866   :  { %v804_v63 = vpop.f32.mrf.mxu0 }
 0x867   :  { %v805_v12 = vadd.f32 %v2611_v45, %v804_v63  ;;  %v1309_v63 = vsub.s32 4, %v2573_v25 }
 0x868   :  { %v2134_v13 = vpop.f32.mrf.mxu0 }
 0x869   :  { %v817_v14 = vmul.f32 %v815_v2, %v805_v12  ;;  %v808_v15 = vadd.f32 %v805_v12, %v2671_v40  ;;  %v1310_v2 = vrot.slane %v2578_v26, %v1309_v63 }
 0x86b   :  { %819 = vrot.lane.b32.xlu1 %v817_v14, %s2379_s19  ;;  %1312 = vrot.lane.b32.xlu0 %v1310_v2, %s2378_s17 }
 0x8dd   :  { %v820_v24 = vpop.permute.xlu1 %819 }
 0x8de   :  { %v2726_v27 = vadd.f32 %v820_v24, %v808_v15 }
 0x8e0   :  { %2138 = vmatmul.mubr.msk.f32.vlgmr.msra.gmra.mxu1 %vm70_vm1, %v2726_v27 }
 0x8e1   :  { %2160 = vmatpush3.msra.mxu1 %v2520_v16  ;;  %2175 = vmatprep.mubr.msk.f32.mxu1 %vm2377_vm2, %v2376_v1 }
 0x8e2   :  { %2161 = vmatprep.subr.mxu1 %v2376_v1 }
 0x8e3   :  { %2162 = vmatpush3.msra.mxu1 %v2527_v17 }
 0x8e4   :  { %2163 = vmatprep.subr.mxu1 %v2376_v1 }
 0x8e5   :  { %2164 = vmatpush3.msra.mxu1 %v2534_v18 }
 0x8e6   :  { %2165 = vmatprep.subr.mxu1 %v2376_v1 }
 0x8e7   :  { %2166 = vmatpush3.msra.mxu1 %v2541_v19 }
 0x8e8   :  { %2167 = vmatprep.subr.mxu1 %v2376_v1 }
 0x8e9   :  { %2168 = vmatpush3.msra.mxu1 %v2548_v20 }
 0x8ea   :  { %2169 = vmatprep.subr.mxu1 %v2376_v1 }
 0x8eb   :  { %2170 = vmatpush3.msra.mxu1 %v2555_v21 }
 0x8ec   :  { %2171 = vmatprep.subr.mxu1 %v2376_v1 }
 0x8ed   :  { %2172 = vmatpush3.msra.mxu1 %v2562_v22 }
 0x8ee   :  { %2173 = vmatprep.subr.mxu1 %v2376_v1 }
 0x8ef   :  { %2174 = vmatpush3.msra.mxu1 %v2569_v23 }
 0x8f0   :  { %2183 = vmatprep.subr.mxu1 %v2376_v1 }
 0x9a0   :  { %v892_v28 = vpop.f32.mrf.mxu1 }
 0x9a1   :  { %v893_v30 = vadd.f32 %v2508_v11, %v892_v28 }
 0x9a2   :  { %v2139_v31 = vpop.f32.mrf.mxu1 }
 0x9a3   :  { %2330 = vtanh.f32 %v893_v30 }
 0x9b0   :  { %v2331_v32 = vpop.eup %2330 }
 0x9b1   :  { %2157 = vmatmul.mubr.msk.f32.vlgmr.msra.gmra.mxu0 %vm149_vm3, %v2331_v32 }
 0x9b2   :  { %2179 = vmatpush3.msk.msra.mxu0 %vm74_vm0, %v2429_v0  ;;  %2180 = vmatprep.mubr.msk.f32.mxu0 %vm2377_vm2, %v2376_v1 }
 0x9b3   :  { %2202 = vmatprep.subr.mxu0 %v2376_v1 }
 0xa71   :  { %v966_v35 = vpop.f32.mrf.mxu0 }
 0xa72   :  { %v967_v36 = vadd.f32 %v2586_v29, %v966_v35 }
 0xa73   :  { %v2158_v37 = vpop.f32.mrf.mxu0 }
 0xa74   :  { %v971_v38 = vmin.f32 %v967_v36, 20.0  ;;  %vm970_vm11 = vcmp.gt.f32.partialorder %v967_v36, 20.0 }
 0xa76   :  { %v972_v39 = vmul.f32 1.442695, %v971_v38 }
 0xa78   :  { %2332 = vpow2.f32 %v972_v39  ;;  %v1313_v39 = vpop.permute.xlu0 %1312 }
 0xa85   :  { %v2333_v40 = vpop.eup %2332 }
 0xa86   :  { %v974_v41 = vadd.f32 1.0, %v2333_v40  ;;  %v977_v42 = vmul.f32 -0.5, %v2333_v40  ;;  %v980_v44 = vand.u32 2147483647, %v2333_v40 }
 0xa88   :  { %2334 = vlog2.f32 %v974_v41  ;;  %v978_v43 = vadd.f32 1.0, %v977_v42  ;;  %vm981_vm10 = vcmp.lt.f32.partialorder %v980_v44, 0.0004427343 }
 0xa8a   :  { %v979_v48 = vmul.f32 %v2333_v40, %v978_v43 }
 0xa95   :  { %v2335_v46 = vpop.eup %2334 }
 0xa96   :  { %v976_v47 = vmul.f32 0.6931472, %v2335_v46 }
 0xa98   :  { %v982_v49 = vsel %vm981_vm10, %v979_v48, %v976_v47 }
 0xa99   :  { %v983_v50 = vsel %vm970_vm11, %v967_v36, %v982_v49 }
 0xa9a   :  { %2176 = vmatmul.mubr.msk.f32.vlgmr.msra.gmra.mxu1 %vm149_vm3, %v983_v50 }
 0xa9b   :  { %2184 = vmatpush3.msra.mxu1 %v2452_v3  ;;  %2199 = vmatprep.mubr.msk.f32.mxu1 %vm2377_vm2, %v2376_v1 }
 0xa9c   :  { %2185 = vmatprep.subr.mxu1 %v2376_v1 }
 0xa9d   :  { %2186 = vmatpush3.msra.mxu1 %v2459_v4 }
 0xa9e   :  { %2187 = vmatprep.subr.mxu1 %v2376_v1 }
 0xa9f   :  { %2188 = vmatpush3.msra.mxu1 %v2464_v5 }
 0xaa0   :  { %2189 = vmatprep.subr.mxu1 %v2376_v1 }
 0xaa1   :  { %2190 = vmatpush3.msra.mxu1 %v2471_v6 }
 0xaa2   :  { %2191 = vmatprep.subr.mxu1 %v2376_v1 }
 0xaa3   :  { %2192 = vmatpush3.msra.mxu1 %v2478_v7 }
 0xaa4   :  { %2193 = vmatprep.subr.mxu1 %v2376_v1 }
 0xaa5   :  { %2194 = vmatpush3.msra.mxu1 %v2485_v8 }
 0xaa6   :  { %2195 = vmatprep.subr.mxu1 %v2376_v1 }
 0xaa7   :  { %2196 = vmatpush3.msra.mxu1 %v2492_v9 }
 0xaa8   :  { %2197 = vmatprep.subr.mxu1 %v2376_v1 }
 0xaa9   :  { %2198 = vmatpush3.msra.mxu1 %v2499_v10 }
 0xaaa   :  { %2221 = vmatprep.subr.mxu1 %v2376_v1 }
 0xb5a   :  { %v1053_v51 = vpop.f32.mrf.mxu1 }
 0xb5b   :  { %v1054_v53 = vadd.f32 %v2611_v45, %v1053_v51  ;;  %v1558_v51 = vsub.s32 5, %v2573_v25 }
 0xb5c   :  { %v2177_v54 = vpop.f32.mrf.mxu1 }
 0xb5d   :  { %v1066_v55 = vmul.f32 %v1064_v52, %v1054_v53  ;;  %v1057_v56 = vadd.f32 %v1054_v53, %v2726_v27  ;;  %v1559_v52 = vrot.slane %v2578_v26, %v1558_v51 }
 0xb5f   :  { %1068 = vrot.lane.b32.xlu1 %v1066_v55, %s2379_s19  ;;  %1561 = vrot.lane.b32.xlu0 %v1559_v52, %s2378_s17 }
 0xbd1   :  { %v1069_v57 = vpop.permute.xlu1 %1068 }
 0xbd2   :  { %v2781_v58 = vadd.f32 %v1069_v57, %v1057_v56 }
 0xbd4   :  { %2181 = vmatmul.mubr.msk.f32.vlgmr.msra.gmra.mxu0 %vm70_vm1, %v2781_v58 }
 0xbd5   :  { %2203 = vmatpush3.msra.mxu0 %v2520_v16  ;;  %2218 = vmatprep.mubr.msk.f32.mxu0 %vm2377_vm2, %v2376_v1 }
 0xbd6   :  { %2204 = vmatprep.subr.mxu0 %v2376_v1 }
 0xbd7   :  { %2205 = vmatpush3.msra.mxu0 %v2527_v17 }
 0xbd8   :  { %2206 = vmatprep.subr.mxu0 %v2376_v1 }
 0xbd9   :  { %2207 = vmatpush3.msra.mxu0 %v2534_v18 }
 0xbda   :  { %2208 = vmatprep.subr.mxu0 %v2376_v1 }
 0xbdb   :  { %2209 = vmatpush3.msra.mxu0 %v2541_v19 }
 0xbdc   :  { %2210 = vmatprep.subr.mxu0 %v2376_v1 }
 0xbdd   :  { %2211 = vmatpush3.msra.mxu0 %v2548_v20 }
 0xbde   :  { %2212 = vmatprep.subr.mxu0 %v2376_v1 }
 0xbdf   :  { %2213 = vmatpush3.msra.mxu0 %v2555_v21 }
 0xbe0   :  { %2214 = vmatprep.subr.mxu0 %v2376_v1 }
 0xbe1   :  { %2215 = vmatpush3.msra.mxu0 %v2562_v22 }
 0xbe2   :  { %2216 = vmatprep.subr.mxu0 %v2376_v1 }
 0xbe3   :  { %2217 = vmatpush3.msra.mxu0 %v2569_v23 }
 0xbe4   :  { %2226 = vmatprep.subr.mxu0 %v2376_v1 }
 0xc94   :  { %v1141_v59 = vpop.f32.mrf.mxu0 }
 0xc95   :  { %v1142_v60 = vadd.f32 %v2508_v11, %v1141_v59 }
 0xc96   :  { %v2182_v61 = vpop.f32.mrf.mxu0 }
 0xc97   :  { %2336 = vtanh.f32 %v1142_v60 }
 0xca4   :  { %v2337_v62 = vpop.eup %2336 }
 0xca5   :  { %2200 = vmatmul.mubr.msk.f32.vlgmr.msra.gmra.mxu1 %vm149_vm3, %v2337_v62 }
 0xca6   :  { %2222 = vmatpush3.msk.msra.mxu1 %vm74_vm0, %v2429_v0  ;;  %2223 = vmatprep.mubr.msk.f32.mxu1 %vm2377_vm2, %v2376_v1 }
 0xca7   :  { %2245 = vmatprep.subr.mxu1 %v2376_v1 }
 0xd65   :  { %v1215_v12 = vpop.f32.mrf.mxu1 }
 0xd66   :  { %v1216_v13 = vadd.f32 %v2586_v29, %v1215_v12 }
 0xd67   :  { %v2201_v14 = vpop.f32.mrf.mxu1 }
 0xd68   :  { %v1220_v15 = vmin.f32 %v1216_v13, 20.0  ;;  %vm1219_vm13 = vcmp.gt.f32.partialorder %v1216_v13, 20.0 }
 0xd6a   :  { %v1221_v24 = vmul.f32 1.442695, %v1220_v15 }
 0xd6c   :  { %2338 = vpow2.f32 %v1221_v24 }
 0xd79   :  { %v2339_v27 = vpop.eup %2338 }
 0xd7a   :  { %v1223_v28 = vadd.f32 1.0, %v2339_v27  ;;  %v1226_v30 = vmul.f32 -0.5, %v2339_v27  ;;  %v1229_v32 = vand.u32 2147483647, %v2339_v27 }
 0xd7c   :  { %2340 = vlog2.f32 %v1223_v28  ;;  %v1227_v31 = vadd.f32 1.0, %v1226_v30  ;;  %vm1230_vm12 = vcmp.lt.f32.partialorder %v1229_v32, 0.0004427343 }
 0xd7e   :  { %v1228_v35 = vmul.f32 %v2339_v27, %v1227_v31 }
 0xd89   :  { %v2341_v33 = vpop.eup %2340 }
 0xd8a   :  { %v1225_v34 = vmul.f32 0.6931472, %v2341_v33 }
 0xd8c   :  { %v1231_v36 = vsel %vm1230_vm12, %v1228_v35, %v1225_v34 }
 0xd8d   :  { %v1232_v37 = vsel %vm1219_vm13, %v1216_v13, %v1231_v36 }
 0xd8e   :  { %2219 = vmatmul.mubr.msk.f32.vlgmr.msra.gmra.mxu0 %vm149_vm3, %v1232_v37 }
 0xd8f   :  { %2227 = vmatpush3.msra.mxu0 %v2452_v3  ;;  %2242 = vmatprep.mubr.msk.f32.mxu0 %vm2377_vm2, %v2376_v1 }
 0xd90   :  { %2228 = vmatprep.subr.mxu0 %v2376_v1 }
 0xd91   :  { %2229 = vmatpush3.msra.mxu0 %v2459_v4 }
 0xd92   :  { %2230 = vmatprep.subr.mxu0 %v2376_v1 }
 0xd93   :  { %2231 = vmatpush3.msra.mxu0 %v2464_v5 }
 0xd94   :  { %2232 = vmatprep.subr.mxu0 %v2376_v1 }
 0xd95   :  { %2233 = vmatpush3.msra.mxu0 %v2471_v6 }
 0xd96   :  { %2234 = vmatprep.subr.mxu0 %v2376_v1 }
 0xd97   :  { %2235 = vmatpush3.msra.mxu0 %v2478_v7 }
 0xd98   :  { %2236 = vmatprep.subr.mxu0 %v2376_v1 }
 0xd99   :  { %2237 = vmatpush3.msra.mxu0 %v2485_v8 }
 0xd9a   :  { %2238 = vmatprep.subr.mxu0 %v2376_v1 }
 0xd9b   :  { %2239 = vmatpush3.msra.mxu0 %v2492_v9 }
 0xd9c   :  { %2240 = vmatprep.subr.mxu0 %v2376_v1 }
 0xd9d   :  { %2241 = vmatpush3.msra.mxu0 %v2499_v10 }
 0xd9e   :  { %2264 = vmatprep.subr.mxu0 %v2376_v1 }
 0xe4e   :  { %v1302_v38 = vpop.f32.mrf.mxu0 }
 0xe4f   :  { %v1303_v40 = vadd.f32 %v2611_v45, %v1302_v38 }
 0xe50   :  { %v2220_v41 = vpop.f32.mrf.mxu0 }
 0xe51   :  { %v1315_v42 = vmul.f32 %v1313_v39, %v1303_v40  ;;  %v1306_v43 = vadd.f32 %v1303_v40, %v2781_v58 }
 0xe53   :  { %1317 = vrot.lane.b32.xlu1 %v1315_v42, %s2379_s19 }
 0xec5   :  { %v1318_v44 = vpop.permute.xlu1 %1317 }
 0xec6   :  { %v2836_v46 = vadd.f32 %v1318_v44, %v1306_v43 }
 0xec8   :  { %2224 = vmatmul.mubr.msk.f32.vlgmr.msra.gmra.mxu1 %vm70_vm1, %v2836_v46 }
 0xec9   :  { %2246 = vmatpush3.msra.mxu1 %v2520_v16  ;;  %2261 = vmatprep.mubr.msk.f32.mxu1 %vm2377_vm2, %v2376_v1 }
 0xeca   :  { %2247 = vmatprep.subr.mxu1 %v2376_v1 }
 0xecb   :  { %2248 = vmatpush3.msra.mxu1 %v2527_v17 }
 0xecc   :  { %2249 = vmatprep.subr.mxu1 %v2376_v1 }
 0xecd   :  { %2250 = vmatpush3.msra.mxu1 %v2534_v18 }
 0xece   :  { %2251 = vmatprep.subr.mxu1 %v2376_v1 }
 0xecf   :  { %2252 = vmatpush3.msra.mxu1 %v2541_v19 }
 0xed0   :  { %2253 = vmatprep.subr.mxu1 %v2376_v1 }
 0xed1   :  { %2254 = vmatpush3.msra.mxu1 %v2548_v20 }
 0xed2   :  { %2255 = vmatprep.subr.mxu1 %v2376_v1 }
 0xed3   :  { %2256 = vmatpush3.msra.mxu1 %v2555_v21 }
 0xed4   :  { %2257 = vmatprep.subr.mxu1 %v2376_v1 }
 0xed5   :  { %2258 = vmatpush3.msra.mxu1 %v2562_v22 }
 0xed6   :  { %2259 = vmatprep.subr.mxu1 %v2376_v1 }
 0xed7   :  { %2260 = vmatpush3.msra.mxu1 %v2569_v23 }
 0xed8   :  { %2269 = vmatprep.subr.mxu1 %v2376_v1 }
 0xf88   :  { %v1390_v47 = vpop.f32.mrf.mxu1 }
 0xf89   :  { %v1391_v48 = vadd.f32 %v2508_v11, %v1390_v47 }
 0xf8a   :  { %v2225_v49 = vpop.f32.mrf.mxu1 }
 0xf8b   :  { %2342 = vtanh.f32 %v1391_v48 }
 0xf98   :  { %v2343_v50 = vpop.eup %2342 }
 0xf99   :  { %2243 = vmatmul.mubr.msk.f32.vlgmr.msra.gmra.mxu0 %vm149_vm3, %v2343_v50 }
 0xf9a   :  { %2265 = vmatpush3.msk.msra.mxu0 %vm74_vm0, %v2429_v0  ;;  %2266 = vmatprep.mubr.msk.f32.mxu0 %vm2377_vm2, %v2376_v1 }
 0xf9b   :  { %2288 = vmatprep.subr.mxu0 %v2376_v1 }
0x1059   :  { %v1464_v53 = vpop.f32.mrf.mxu0 }
0x105a   :  { %v1465_v54 = vadd.f32 %v2586_v29, %v1464_v53 }
0x105b   :  { %v2244_v55 = vpop.f32.mrf.mxu0 }
0x105c   :  { %v1469_v56 = vmin.f32 %v1465_v54, 20.0  ;;  %vm1468_vm15 = vcmp.gt.f32.partialorder %v1465_v54, 20.0 }
0x105e   :  { %v1470_v57 = vmul.f32 1.442695, %v1469_v56 }
0x1060   :  { %2344 = vpow2.f32 %v1470_v57 }
0x106d   :  { %v2345_v58 = vpop.eup %2344 }
0x106e   :  { %v1472_v0 = vadd.f32 1.0, %v2345_v58  ;;  %v1475_v59 = vmul.f32 -0.5, %v2345_v58  ;;  %v1478_v61 = vand.u32 2147483647, %v2345_v58 }
0x1070   :  { %2346 = vlog2.f32 %v1472_v0  ;;  %v1476_v60 = vadd.f32 1.0, %v1475_v59  ;;  %vm1479_vm14 = vcmp.lt.f32.partialorder %v1478_v61, 0.0004427343 }
0x1072   :  { %v1477_v2 = vmul.f32 %v2345_v58, %v1476_v60 }
0x107d   :  { %v2347_v62 = vpop.eup %2346 }
0x107e   :  { %v1474_v63 = vmul.f32 0.6931472, %v2347_v62 }
0x1080   :  { %v1480_v12 = vsel %vm1479_vm14, %v1477_v2, %v1474_v63 }
0x1081   :  { %v1481_v13 = vsel %vm1468_vm15, %v1465_v54, %v1480_v12 }
0x1082   :  { %2262 = vmatmul.mubr.msk.f32.vlgmr.msra.gmra.mxu1 %vm149_vm3, %v1481_v13 }
0x1083   :  { %2270 = vmatpush3.msra.mxu1 %v2452_v3  ;;  %2285 = vmatprep.mubr.msk.f32.mxu1 %vm2377_vm2, %v2376_v1 }
0x1084   :  { %2271 = vmatprep.subr.mxu1 %v2376_v1 }
0x1085   :  { %2272 = vmatpush3.msra.mxu1 %v2459_v4  ;;  %v1562_v4 = vpop.permute.xlu0 %1561 }
0x1086   :  { %2273 = vmatprep.subr.mxu1 %v2376_v1 }
0x1087   :  { %2274 = vmatpush3.msra.mxu1 %v2464_v5 }
0x1088   :  { %2275 = vmatprep.subr.mxu1 %v2376_v1 }
0x1089   :  { %2276 = vmatpush3.msra.mxu1 %v2471_v6 }
0x108a   :  { %2277 = vmatprep.subr.mxu1 %v2376_v1 }
0x108b   :  { %2278 = vmatpush3.msra.mxu1 %v2478_v7 }
0x108c   :  { %2279 = vmatprep.subr.mxu1 %v2376_v1 }
0x108d   :  { %2280 = vmatpush3.msra.mxu1 %v2485_v8 }
0x108e   :  { %2281 = vmatprep.subr.mxu1 %v2376_v1 }
0x108f   :  { %2282 = vmatpush3.msra.mxu1 %v2492_v9 }
0x1090   :  { %2283 = vmatprep.subr.mxu1 %v2376_v1 }
0x1091   :  { %2284 = vmatpush3.msra.mxu1 %v2499_v10 }
0x1142   :  { %v1551_v3 = vpop.f32.mrf.mxu1 }
0x1143   :  { %v1552_v5 = vadd.f32 %v2611_v45, %v1551_v3 }
0x1144   :  { %v2263_v6 = vpop.f32.mrf.mxu1 }
0x1145   :  { %v1564_v14 = vmul.f32 %v1562_v4, %v1552_v5  ;;  %v1555_v7 = vadd.f32 %v1552_v5, %v2836_v46 }
0x1147   :  { %1566 = vrot.lane.b32.xlu1 %v1564_v14, %s2379_s19 }
0x11b9   :  { %v1567_v15 = vpop.permute.xlu1 %1566 }
0x11ba   :  { %v1569_v8 = vadd.f32 %v1567_v15, %v1555_v7 }
0x11bc   :  { %2267 = vmatmul.mubr.msk.f32.vlgmr.msra.gmra.mxu0 %vm70_vm1, %v1569_v8 }
0x11bd   :  { %2289 = vmatpush3.msra.mxu0 %v2520_v16  ;;  %2304 = vmatprep.mubr.msk.f32.mxu0 %vm2377_vm2, %v2376_v1  ;;  %vm1819_vm2 = vcmask 17408  }
0x11be   :  { %2290 = vmatprep.subr.mxu0 %v2376_v1 }
0x11bf   :  { %2291 = vmatpush3.msra.mxu0 %v2527_v17 }
0x11c0   :  { %2292 = vmatprep.subr.mxu0 %v2376_v1 }
0x11c1   :  { %2293 = vmatpush3.msra.mxu0 %v2534_v18  ;;  %v1807_v18 = vsub.s32 6, %v2573_v25 }
0x11c2   :  { %2294 = vmatprep.subr.mxu0 %v2376_v1 }
0x11c3   :  { %2295 = vmatpush3.msra.mxu0 %v2541_v19  ;;  %v1808_v19 = vrot.slane %v2578_v26, %v1807_v18 }
0x11c4   :  { %2296 = vmatprep.subr.mxu0 %v2376_v1 }
0x11c5   :  { %2297 = vmatpush3.msra.mxu0 %v2548_v20  ;;  %1810 = vrot.lane.b32.xlu0 %v1808_v19, %s2378_s17 }
0x11c6   :  { %2298 = vmatprep.subr.mxu0 %v2376_v1 }
0x11c7   :  { %2299 = vmatpush3.msra.mxu0 %v2555_v21 }
0x11c8   :  { %2300 = vmatprep.subr.mxu0 %v2376_v1 }
0x11c9   :  { %2301 = vmatpush3.msra.mxu0 %v2562_v22 }
0x11ca   :  { %2302 = vmatprep.subr.mxu0 %v2376_v1 }
0x11cb   :  { %2303 = vmatpush3.msra.mxu0 %v2569_v23 }
0x1237   :  { %v1811_v34 = vpop.permute.xlu0 %1810 }
0x127c   :  { %v1639_v9 = vpop.f32.mrf.mxu0 }
0x127d   :  { %v1640_v10 = vadd.f32 %v2508_v11, %v1639_v9 }
0x127e   :  { %v2268_v16 = vpop.f32.mrf.mxu0 }
0x127f   :  { %2348 = vtanh.f32 %v1640_v10 }
0x128c   :  { %v2349_v17 = vpop.eup %2348 }
0x128d   :  { %2286 = vmatmul.mubr.msk.f32.vlgmr.msra.gmra.mxu1 %vm149_vm3, %v2349_v17 }
0x134d   :  { %v1713_v20 = vpop.f32.mrf.mxu1 }
0x134e   :  { %v1714_v21 = vadd.f32 %v2586_v29, %v1713_v20 }
0x134f   :  { %v2287_v1 = vpop.f32.mrf.mxu1 }
0x1350   :  { %v1718_v22 = vmin.f32 %v1714_v21, 20.0  ;;  %vm1717_vm1 = vcmp.gt.f32.partialorder %v1714_v21, 20.0 }
0x1352   :  { %v1719_v23 = vmul.f32 1.442695, %v1718_v22 }
0x1354   :  { %2350 = vpow2.f32 %v1719_v23 }
0x1361   :  { %v2351_v24 = vpop.eup %2350 }
0x1362   :  { %v1721_v11 = vadd.f32 1.0, %v2351_v24  ;;  %v1724_v27 = vmul.f32 -0.5, %v2351_v24  ;;  %v1727_v30 = vand.u32 2147483647, %v2351_v24 }
0x1364   :  { %2352 = vlog2.f32 %v1721_v11  ;;  %v1725_v28 = vadd.f32 1.0, %v1724_v27  ;;  %vm1728_vm0 = vcmp.lt.f32.partialorder %v1727_v30, 0.0004427343 }
0x1366   :  { %v1726_v25 = vmul.f32 %v2351_v24, %v1725_v28 }
0x1371   :  { %v2353_v31 = vpop.eup %2352 }
0x1372   :  { %v1723_v32 = vmul.f32 0.6931472, %v2353_v31 }
0x1374   :  { %v1729_v26 = vsel %vm1728_vm0, %v1726_v25, %v1723_v32 }
0x1375   :  { %v1730_v33 = vsel %vm1717_vm1, %v1714_v21, %v1729_v26 }
0x1376   :  { %2305 = vmatmul.mubr.msk.f32.vlgmr.msra.gmra.mxu0 %vm149_vm3, %v1730_v33 }
0x1436   :  { %v1800_v29 = vpop.f32.mrf.mxu0 }
0x1437   :  { %v1801_v35 = vadd.f32 %v2611_v45, %v1800_v29 }
0x1438   :  { %v2306_v36 = vpop.f32.mrf.mxu0 }
0x1439   :  { %v1813_v37 = vmul.f32 %v1811_v34, %v1801_v35  ;;  %v1804_v38 = vadd.f32 %v1801_v35, %v1569_v8 }
0x143b   :  { %1815 = vrot.lane.b32.xlu1 %v1813_v37, %s2379_s19 }
0x14ad   :  { %v1816_v39 = vpop.permute.xlu1 %1815 }
0x14ae   :  { %v1818_v40 = vadd.f32 %v1816_v39, %v1804_v38 }
0x14b0   :  { %1820 = vst.msk [vmem:[#allocation2] sm:$0x3] %vm1819_vm2, %v1818_v40 }
0x14b1   :  { %2365 = shalt.err (!%p2362_p4)
}
0x14b2   :  { %1830 = dma.vmem_to_hbm [thread:$0]  %s1828_s20, 32, %s2928_s8, [#allocation3]  }
0x14b3   :  { %2374 = dma.done.wait [#allocation3], 32  }
0x14b4   :  { %2375 = vsyncadd [#allocation3], 4294967264 }
0x14b5   :  { %1834 = vsyncpa [#allocation3], 1 }

</bundles_post_ra>
